<compile_context>
chip_gen: v7x
topology: tpu7x:2x2x1
jax: 0.10.0
libtpu: 0.0.40
codegen_flags: <defaults>
</compile_context>

<pallas_src>
import jax
import jax.numpy as jnp
from jax.experimental import pallas as pl
from jax.experimental.pallas import tpu as pltpu

# ----- config (small shapes consistent with MoE(__init__) args) -----
N_METRICS = 2
INPUT_SIZE = 32
OUTPUT_SIZE = 8
NUM_EXPERTS = 8
HIDDEN_SIZE = 32
TOP_K = 4
BATCH = 8
NOISE_EPSILON = 0.01
LOSS_COEF = 0.01
EPS = 2.220446049250313e-16  # np.finfo(float).eps


# ---------------- Pallas kernels ----------------

def gating_kernel(x_ref, w_ref, o_ref):
    # one matmul produces clean logits + raw noise logits for ALL metrics
    o_ref[...] = jnp.dot(x_ref[...], w_ref[...], preferred_element_type=jnp.float32)


def gating_matmul(x, w_all):
    B, D = x.shape
    N = w_all.shape[1]
    return pl.pallas_call(
        gating_kernel,
        out_shape=jax.ShapeDtypeStruct((B, N), jnp.float32),
        grid=(1,),
        in_specs=[pl.BlockSpec((B, D), lambda i: (0, 0)),
                  pl.BlockSpec((D, N), lambda i: (0, 0))],
        out_specs=pl.BlockSpec((B, N), lambda i: (0, 0)),
    )(x, w_all)


def moe_combine_kernel(x_ref, w1_ref, b1_ref, w2_ref, b2_ref, gates_ref,
                       summat_ref, y_ref):
    # fc1 for all experts at once: (B, D) @ (D, E*H)
    h = jnp.dot(x_ref[...], w1_ref[...], preferred_element_type=jnp.float32)
    h = jnp.maximum(h + b1_ref[...], 0.0)
    # fc2 for all experts at once via block-diagonal weights: (B, E*H) @ (E*H, E*O)
    o = jnp.dot(h, w2_ref[...], preferred_element_type=jnp.float32) + b2_ref[...]
    # TODO(synk): exp of raw expert outputs can overflow for large activations
    # (the PyTorch module has the same issue); a log-sum-exp combine would be safer.
    eo = jnp.exp(o)  # (B, E*O), computed once and reused by every metric
    ys = []
    for m in range(N_METRICS):  # static unroll (N_METRICS == 2)
        w = gates_ref[m] * eo                                    # (B, E*O)
        c = jnp.dot(w, summat_ref[...],
                    preferred_element_type=jnp.float32)          # (B, O) sum over experts
        c = jnp.where(c == 0.0, jnp.float32(EPS), c)
        ys.append(jnp.log(c))
    # single lane-dense store of both metrics' outputs
    y_ref[...] = jnp.concatenate(ys, axis=1)


def moe_combine(x, w1_all, b1_all, w2_bd, b2_all, gates_exp, sum_mat):
    B, D = x.shape
    EH = w1_all.shape[1]
    EO = w2_bd.shape[1]
    O = sum_mat.shape[1]
    M = gates_exp.shape[0]
    return pl.pallas_call(
        moe_combine_kernel,
        out_shape=jax.ShapeDtypeStruct((B, M * O), jnp.float32),
        grid=(1,),
        in_specs=[
            pl.BlockSpec((B, D), lambda i: (0, 0)),          # x
            pl.BlockSpec((D, EH), lambda i: (0, 0)),         # W1 (all experts, concat)
            pl.BlockSpec((1, EH), lambda i: (0, 0)),         # b1 (flattened)
            pl.BlockSpec((EH, EO), lambda i: (0, 0)),        # W2 (block-diagonal)
            pl.BlockSpec((1, EO), lambda i: (0, 0)),         # b2 (flattened)
            pl.BlockSpec((M, B, EO), lambda i: (0, 0, 0)),   # gates expanded per output
            pl.BlockSpec((EO, O), lambda i: (0, 0)),         # expert-sum matrix
        ],
        out_specs=pl.BlockSpec((B, M * O), lambda i: (0, 0)),
        compiler_params=pltpu.CompilerParams(
            dimension_semantics=("arbitrary",)),
    )(x, w1_all, b1_all, w2_bd, b2_all, gates_exp, sum_mat)


# ---------------- plain-JAX glue (gating top-k / noise / losses) ----------------

def cv_squared(v):
    # torch: x.float().var() / (x.float().mean()**2 + 1e-8), unbiased variance
    v = v.astype(jnp.float32)
    if v.shape[0] == 1:
        return jnp.float32(0.0)
    return jnp.var(v, ddof=1) / (jnp.mean(v) ** 2 + 1e-8)


def noisy_top_k_gating_all(x, w_gate, w_noise, noise_keys, train):
    """Compute gates for all metrics. Gating matmuls are fused into ONE Pallas call."""
    B, D = x.shape
    E = NUM_EXPERTS
    M = N_METRICS
    wg_flat = jnp.transpose(w_gate, (1, 0, 2)).reshape(D, M * E)
    wn_flat = jnp.transpose(w_noise, (1, 0, 2)).reshape(D, M * E)
    w_all = jnp.concatenate([wg_flat, wn_flat], axis=1)          # (D, 2*M*E)
    logits_all = gating_matmul(x, w_all)                         # (B, 2*M*E)

    gates_list, loads = [], []
    for m in range(M):
        clean = logits_all[:, m * E:(m + 1) * E]
        if train:
            raw_noise = logits_all[:, (M + m) * E:(M + m + 1) * E]
            std = jax.nn.softplus(raw_noise) + NOISE_EPSILON
            logits = clean + jax.random.normal(
                noise_keys[m], clean.shape, jnp.float32) * std
        else:
            logits = clean
        kk = min(TOP_K + 1, E)
        top_logits, top_idx = jax.lax.top_k(logits, kk)
        top_k_gates = jax.nn.softmax(top_logits[:, :TOP_K], axis=1)
        rows = jnp.arange(B)[:, None]
        gates = jnp.zeros((B, E), jnp.float32).at[
            rows, top_idx[:, :TOP_K]].set(top_k_gates)
        gates_list.append(gates)
        loads.append((gates > 0).sum(0))
    return jnp.stack(gates_list), loads


def moe_forward(params, x, key, train=True, loss_coef=LOSS_COEF):
    E, D, H = params["w1"].shape
    O = params["w2"].shape[2]
    M = N_METRICS

    # one-time weight layout plumbing (outside the kernel, done by XLA)
    w1_all = jnp.transpose(params["w1"], (1, 0, 2)).reshape(D, E * H)   # (D, E*H)
    b1_all = params["b1"].reshape(1, E * H)
    w2_bd = jax.scipy.linalg.block_diag(
        *[params["w2"][e] for e in range(E)])                           # (E*H, E*O)
    b2_all = params["b2"].reshape(1, E * O)
    sum_mat = jnp.tile(jnp.eye(O, dtype=jnp.float32), (E, 1))           # (E*O, O)

    noise_keys = jax.random.split(key, M)
    gates, loads = noisy_top_k_gating_all(
        x, params["w_gate"], params["w_noise"], noise_keys, train)      # gates: (M, B, E)

    final_loss = jnp.float32(0.0)
    for m in range(M):
        importance = gates[m].sum(0)
        final_loss = final_loss + (cv_squared(importance) + cv_squared(loads[m])) * loss_coef

    # expand gate column e across that expert's O output lanes -> (M, B, E*O)
    gates_exp = jnp.repeat(gates, O, axis=2)

    y_slab = moe_combine(x, w1_all, b1_all, w2_bd, b2_all, gates_exp, sum_mat)  # (B, M*O)
    all_y = [y_slab[:, m * O:(m + 1) * O] for m in range(M)]
    return all_y, final_loss


# ---------------- pure-JAX reference (for validation) ----------------

def moe_forward_ref(params, x, key, train=True, loss_coef=LOSS_COEF):
    all_y = []
    final_loss = jnp.float32(0.0)
    noise_keys = jax.random.split(key, N_METRICS)
    for gate_idx in range(N_METRICS):
        wg = params["w_gate"][gate_idx]
        wn = params["w_noise"][gate_idx]
        clean = x @ wg
        if train:
            std = jax.nn.softplus(x @ wn) + NOISE_EPSILON
            logits = clean + jax.random.normal(noise_keys[gate_idx], clean.shape) * std
        else:
            logits = clean
        kk = min(TOP_K + 1, NUM_EXPERTS)
        top_logits, top_idx = jax.lax.top_k(logits, kk)
        top_k_gates = jax.nn.softmax(top_logits[:, :TOP_K], axis=1)
        rows = jnp.arange(x.shape[0])[:, None]
        gates = jnp.zeros((x.shape[0], NUM_EXPERTS), jnp.float32).at[
            rows, top_idx[:, :TOP_K]].set(top_k_gates)
        load = (gates > 0).sum(0)
        loss = (cv_squared(gates.sum(0)) + cv_squared(load)) * loss_coef

        h = jnp.maximum(
            jnp.einsum("bd,edh->ebh", x, params["w1"]) + params["b1"][:, None, :], 0.0)
        o = jnp.einsum("ebh,eho->ebo", h, params["w2"]) + params["b2"][:, None, :]
        combined = jnp.sum(gates.T[:, :, None] * jnp.exp(o), axis=0)
        combined = jnp.where(combined == 0.0, jnp.float32(EPS), combined)
        all_y.append(jnp.log(combined))
        final_loss = final_loss + loss
    return all_y, final_loss


# ---------------- params ----------------

def init_params(key):
    ks = jax.random.split(key, 6)

    def uinit(k, shape, fan_in):
        b = 1.0 / jnp.sqrt(jnp.float32(fan_in))
        return jax.random.uniform(k, shape, jnp.float32, -b, b)

    w1 = uinit(ks[0], (NUM_EXPERTS, INPUT_SIZE, HIDDEN_SIZE), INPUT_SIZE)
    b1 = uinit(ks[1], (NUM_EXPERTS, HIDDEN_SIZE), INPUT_SIZE)
    w2 = uinit(ks[2], (NUM_EXPERTS, HIDDEN_SIZE, OUTPUT_SIZE), HIDDEN_SIZE)
    b2 = uinit(ks[3], (NUM_EXPERTS, OUTPUT_SIZE), HIDDEN_SIZE)
    # PyTorch __init__ uses zeros for w_gate/w_noise; use small deterministic random
    # values here so routing is non-degenerate in this synthetic test.
    w_gate = 0.1 * jax.random.normal(ks[4], (N_METRICS, INPUT_SIZE, NUM_EXPERTS), jnp.float32)
    w_noise = 0.1 * jax.random.normal(ks[5], (N_METRICS, INPUT_SIZE, NUM_EXPERTS), jnp.float32)
    return dict(w1=w1, b1=b1, w2=w2, b2=b2, w_gate=w_gate, w_noise=w_noise)


if __name__ == "__main__":
    key = jax.random.PRNGKey(0)
    pkey, xkey, nkey = jax.random.split(key, 3)
    params = init_params(pkey)
    x = jax.random.normal(xkey, (BATCH, INPUT_SIZE), jnp.float32)

    all_y, loss = moe_forward(params, x, nkey, train=True)
    all_y = [jax.block_until_ready(y) for y in all_y]
    loss = jax.block_until_ready(loss)

    ref_y, ref_loss = moe_forward_ref(params, x, nkey, train=True)
    for y, ry in zip(all_y, ref_y):
        assert jnp.allclose(y, ry, rtol=1e-5, atol=1e-5), "y mismatch vs reference"
    assert jnp.allclose(loss, ref_loss, rtol=1e-5, atol=1e-5), "loss mismatch vs reference"

    print("KERNEL_OK")
</pallas_src>

<mosaic_0001>
module attributes {stable_mosaic.version = 11 : i64} {
  func.func @gating_kernel(%arg0: i32, %arg1: memref<8x32xf32, #tpu.memory_space<vmem>>, %arg2: memref<32x32xf32, #tpu.memory_space<vmem>>, %arg3: memref<8x32xf32, #tpu.memory_space<vmem>>) attributes {dimension_semantics = [#tpu.dimension_semantics<arbitrary>], iteration_bounds = array<i64: 1>, scalar_prefetch = 0 : i64, scratch_operands = 0 : i64, tpu.core_type = #tpu.core_type<tc>, window_params = [{pipeline_mode = #tpu.pipeline_mode<synchronous>, transform_indices = @transform_0, window_bounds = array<i64: 8, 32>}, {pipeline_mode = #tpu.pipeline_mode<synchronous>, transform_indices = @transform_1, window_bounds = array<i64: 32, 32>}, {pipeline_mode = #tpu.pipeline_mode<synchronous>, transform_indices = @transform_2, window_bounds = array<i64: 8, 32>}]} {
    %c0 = arith.constant 0 : index
    %c0_0 = arith.constant 0 : index
    %0 = vector.load %arg1[%c0, %c0_0] : memref<8x32xf32, #tpu.memory_space<vmem>>, vector<8x32xf32>
    %c0_1 = arith.constant 0 : index
    %c0_2 = arith.constant 0 : index
    %1 = vector.load %arg2[%c0_1, %c0_2] : memref<32x32xf32, #tpu.memory_space<vmem>>, vector<32x32xf32>
    %cst = arith.constant dense<0.000000e+00> : vector<8x32xf32>
    %2 = tpu.matmul %0, %1, %cst {dimension_numbers = #tpu.dot_dimension_numbers<[1], [0], [0], [1], [0, 0, 1, 1], [], []>} : vector<8x32xf32>, vector<32x32xf32>, vector<8x32xf32> -> vector<8x32xf32>
    %c0_3 = arith.constant 0 : index
    %c0_4 = arith.constant 0 : index
    %3 = vector.load %arg3[%c0_3, %c0_4] : memref<8x32xf32, #tpu.memory_space<vmem>>, vector<8x32xf32>
    tpu.vector_store %arg3[%c0_3, %c0_4], %2 {strides = array<i32>} : memref<8x32xf32, #tpu.memory_space<vmem>>, vector<8x32xf32>,
    return
  }
  func.func @transform_0(%arg0: i32) -> (i32, i32) {
    %c0_i32 = arith.constant 0 : i32
    %c0_i32_0 = arith.constant 0 : i32
    %c0_i32_1 = arith.constant 0 : i32
    return %c0_i32, %c0_i32_0 : i32, i32
  }
  func.func @transform_1(%arg0: i32) -> (i32, i32) {
    %c0_i32 = arith.constant 0 : i32
    %c0_i32_0 = arith.constant 0 : i32
    %c0_i32_1 = arith.constant 0 : i32
    return %c0_i32, %c0_i32_0 : i32, i32
  }
  func.func @transform_2(%arg0: i32) -> (i32, i32) {
    %c0_i32 = arith.constant 0 : i32
    %c0_i32_0 = arith.constant 0 : i32
    %c0_i32_1 = arith.constant 0 : i32
    return %c0_i32, %c0_i32_0 : i32, i32
  }
}

</mosaic_0001>

<bundles_post_ra>
// kernel: tpu_custom_call.1
= control target key start
LH: loop header
LB: loop body
LE: loop exit
PB: predicated region body
PF: predicated region fallthrough
CT: control target
= control target key end

     0   :  { %7 = vsyncpa [#allocation3], 0  ;;  %s303_s0 = inlined_call_operand.hbm [shape: f32[8,32], index: 0, kind: input, shape index: {}]   ;;  %s304_s1 = inlined_call_operand.hbm [shape: f32[32,32], index: 1, kind: input, shape index: {}]   ;;  %s305_s2 = inlined_call_operand.hbm [shape: f32[8,32], index: 2, kind: output, shape index: {}]  }
   0x1   :  { %8 = vsyncpa [#allocation6], 0 }
   0x2   :  { %9 = vsyncpa [#allocation4], 0  ;;  %s237_s9 = smov [#allocation2]   ;;  %s238_s11 = smov [#allocation5]  }
   0x3   :  { %s16_s10 = sshll.u32 %s237_s9, 4  ;;  %s25_s12 = sshll.u32 %s238_s11, 4  ;;  %s17_s10 = int_to_ptr.vmem [resolvable:$true] %s16_s10  ;;  %s260_s12 = int_to_ptr.vmem [resolvable:$true] %s25_s12 }
   0x4   :  { %s165_s15 = scalar_lea.hbm %s303_s0, 128 }
   0x5   :  { %p166_p0 = scmp.ne.s32.totalorder %s303_s0, %s165_s15  ;;  %p169_p1 = scmp.lt.u32.totalorder %s165_s15, %s303_s0 }
   0x7   :  { %p171_p2 = pnand %p169_p1, %p166_p0 }
   0x9   :  { %174 = shalt.err (!%p171_p2)
}
   0xa   :  { %s175_s20 = scalar_lea.vmem %s17_s10, 128  ;;  %p180_p4 = scmp.lt.s32.totalorder %s17_s10, %s17_s10 }
   0xb   :  { %p176_p3 = scmp.ne.s32.totalorder %s17_s10, %s175_s20  ;;  %p181_p5 = scmp.lt.s32.totalorder %s175_s20, %s175_s20 }
   0xd   :  { %p182_p6 = por %p181_p5, %p180_p4 }
   0xf   :  { %p183_p7 = pnand %p182_p6, %p176_p3 }
  0x11   :  { %186 = shalt.err (!%p183_p7)
}
  0x12   :  { %19 = dma.hbm_to_vmem [thread:$0]  %s303_s0, 128, %s17_s10, [#allocation3]  }
  0x13   :  { %s187_s25 = scalar_lea.hbm %s304_s1, 512 }
  0x14   :  { %p188_p8 = scmp.ne.s32.totalorder %s304_s1, %s187_s25  ;;  %p191_p9 = scmp.lt.u32.totalorder %s187_s25, %s304_s1 }
  0x16   :  { %p193_p10 = pnand %p191_p9, %p188_p8 }
  0x18   :  { %196 = shalt.err (!%p193_p10)
}
  0x19   :  { %s197_s30 = scalar_lea.vmem %s260_s12, 512  ;;  %p202_p12 = scmp.lt.s32.totalorder %s260_s12, %s260_s12 }
  0x1a   :  { %p198_p11 = scmp.ne.s32.totalorder %s260_s12, %s197_s30  ;;  %p203_p13 = scmp.lt.s32.totalorder %s197_s30, %s197_s30 }
  0x1c   :  { %p204_p0 = por %p203_p13, %p202_p12 }
  0x1e   :  { %p205_p1 = pnand %p204_p0, %p198_p11 }
  0x20   :  { %208 = shalt.err (!%p205_p1)
}
  0x21   :  { %s239_s0 = smov 128   ;;  %s240_s3 = smov 8  }
  0x22   :  { %31 = dma.hbm_to_vmem [thread:$0]  %s304_s1, 512, %s260_s12, [#allocation6], %s239_s0, %s239_s0, %s240_s3  }
  0x23   :  { %231 = dma.done.wait [#allocation3], 128  }
  0x24   :  { %232 = vsyncadd [#allocation3], 4294967168 }
  0x25   :  { %233 = dma.done.wait [#allocation6], 512  }
  0x26   :  { %234 = vsyncadd [#allocation6], 4294966784  ;;  %v241_v0 = vmov 0.0|0.0   ;;  %vm242_vm0 = vmmov 0   ;;  %v243_v1 = vmov 0.0   ;;  %v39_v2 = vld [vmem:[#allocation5] sm:$0xff] }
  0x27   :  { %151 = vmatprep.subr.bf16.mxu0 %v241_v0  ;;  %148 = vmatprep.mubr.msk.f32.mxu0 %vm242_vm0, %v243_v1  ;;  %v40_v3 = vld [vmem:[#allocation5 + $0x8] sm:$0xff]  ;;  %v41_v4 = vld [vmem:[#allocation5 + $0x10] sm:$0xff]  ;;  %v42_v6 = vld [vmem:[#allocation5 + $0x18] sm:$0xff]  ;;  %vm43_vm1 = vcmask 261120   ;;  %s244_s1 = smov [#allocation7]  }
  0x28   :  { %v152_v5 = vpack.c.bf16 %v40_v3, %v39_v2  ;;  %v155_v7 = vpack.c.bf16 %v42_v6, %v41_v4  ;;  %v38_v8 = vld [vmem:[#allocation2] sm:$0xff]  ;;  %s124_s6 = sshll.u32 %s244_s1, 4  ;;  %s125_s6 = int_to_ptr.vmem [resolvable:$true] %s124_s6 }
  0x29   :  { %s209_s7 = scalar_lea.vmem %s125_s6, 128  ;;  %p214_p3 = scmp.lt.s32.totalorder %s125_s6, %s125_s6 }
  0x2a   :  { %153 = vmatpush3.bf16.msra.mxu0 %v152_v5  ;;  %p210_p2 = scmp.ne.s32.totalorder %s125_s6, %s209_s7  ;;  %p215_p4 = scmp.lt.s32.totalorder %s209_s7, %s209_s7 }
  0x2b   :  { %154 = vmatprep.subr.bf16.mxu0 %v241_v0 }
  0x2c   :  { %p216_p5 = por %p215_p4, %p214_p3 }
  0x2e   :  { %156 = vmatpush3.bf16.msra.mxu0 %v155_v7  ;;  %p217_p6 = pnand %p216_p5, %p210_p2 }
  0x31   :  { %149 = vmatmul.mubr.msk.f32.vlgmr.msra.gmra.mrb[0].mxu0 %vm43_vm1, %v38_v8 }
 0x104   :  { %v113_v9 = vpop.f32.mrb[0].mxu0 }
 0x105   :  { %117 = vst.msk [vmem:[#allocation7] sm:$0xff] %vm43_vm1, %v113_v9  ;;  %v150_v10 = vpop.f32.mrb[1].mxu0 }
 0x106   :  { %220 = shalt.err (!%p217_p6)
}
 0x107   :  { %s221_s10 = scalar_lea.hbm %s305_s2, 128 }
 0x108   :  { %p222_p7 = scmp.ne.s32.totalorder %s305_s2, %s221_s10  ;;  %p225_p8 = scmp.lt.u32.totalorder %s221_s10, %s305_s2 }
 0x10a   :  { %p227_p9 = pnand %p225_p8, %p222_p7 }
 0x10c   :  { %230 = shalt.err (!%p227_p9)
}
 0x10d   :  { %127 = dma.vmem_to_hbm [thread:$0]  %s125_s6, 128, %s305_s2, [#allocation4]  }
 0x10e   :  { %235 = dma.done.wait [#allocation4], 128  }
 0x10f   :  { %236 = vsyncadd [#allocation4], 4294967168 }
 0x110   :  { %131 = vsyncpa [#allocation3], 1 }
 0x111   :  { %132 = vsyncpa [#allocation6], 1 }
 0x112   :  { %133 = vsyncpa [#allocation4], 1 }

</bundles_post_ra>
